<compile_context>
chip_gen: v5e
topology: v5e:2x2
jax: 0.10.0
libtpu: 0.0.40
codegen_flags: <defaults>
</compile_context>

<pallas_src>
import functools
import math

import jax
import jax.numpy as jnp
from jax import lax
from jax.experimental import pallas as pl
from jax.experimental.pallas import tpu as pltpu


_GP = 8            # sublane group: each r_prev slot of a factor padded to 8 rows
_LANE = 128        # lane width
_B_TILE_MAX = 512  # max batch tile (multiple of 128)


def _choose_b_tile(batch, i_total):
    """Lane-dense batch tile.  Bigger tiles amortize the per-grid-step overhead;
    when the batch allows, keep >= 2 tiles so both v7x TensorCores get work."""
    if batch <= _LANE:
        return _LANE
    half = (batch + 1) // 2                              # >= 2 tiles when batch > 128
    tile = ((half + _LANE - 1) // _LANE) * _LANE
    tile = min(tile, _B_TILE_MAX)
    # keep the (i_total, tile) one-hot temporary in the low-MiB range
    cap = max(_LANE, ((4 << 20) // (max(i_total, 1) * 4)) // _LANE * _LANE)
    return min(tile, cap)


# ---------------------------------------------------------------------------
# Fused per-entry TT contraction kernel (single block-diagonal MXU gather).
# ---------------------------------------------------------------------------
def _make_tt_entry_kernel(ranks, sizes, b_tile):
    nmode = len(sizes)
    i_total = sum(sizes)
    # row offset of each mode's block inside the fused LHS / gathered result
    m_off, off = [], 0
    for k in range(nmode):
        m_off.append(off)
        off += _GP * ranks[k]

    def kernel(idx_ref, lhs_ref, o_ref):
        # Stacked one-hot for ALL modes: ONE iota, nmode OR'd compares, one cast.
        # (indices already carry per-mode column offsets)
        row_ids = lax.broadcasted_iota(jnp.int32, (i_total, b_tile), 0)
        hit = row_ids == idx_ref[0:1, :]
        for k in range(1, nmode):
            hit = hit | (row_ids == idx_ref[k:k + 1, :])
        onehot = hit.astype(jnp.float32)                         # (I_total, B)

        # ONE MXU matmul gathers every mode's (8-padded) slice at once:
        #   gathered[m_off[k] + i*8 + j, b] = G_k[i, idx_k[b], j]   (padding rows = 0)
        gathered = jnp.dot(lhs_ref[...], onehot,
                           preferred_element_type=jnp.float32)   # (M_total, B)

        # Rank contraction on the VPU; every slice starts on an 8-sublane boundary.
        acc = gathered[0:_GP, :]                                 # mode 0: r_prev == 1
        for k in range(1, nmode):
            base = m_off[k]
            terms = [acc[i:i + 1, :]
                     * gathered[base + i * _GP: base + (i + 1) * _GP, :]
                     for i in range(ranks[k])]
            while len(terms) > 1:                                # pairwise tree sum
                nxt = [terms[j] + terms[j + 1]
                       for j in range(0, len(terms) - 1, 2)]
                if len(terms) & 1:
                    nxt.append(terms[-1])
                terms = nxt
            acc = terms[0]
        # r_N == 1 -> row 0 holds the entry value (rows 1..7 are zero padding).
        o_ref[...] = acc[0:1, :].reshape(1, 1, b_tile)

    return kernel


# ---------------------------------------------------------------------------
# One-time preprocessing (hoisted out of the per-call path).
# ---------------------------------------------------------------------------
def prepare_tt_factors(factors):
    """Pack all TT factors into a single block-diagonal LHS:
       * each factor (r_prev, I_k, r_next) becomes r_prev groups of 8 rows
         (rows j < r_next hold G_k[i, :, j], rest zero) => sublane-aligned slices,
       * modes are stacked block-diagonally so the kernel does ONE one-hot
         gather matmul for all modes.
    Returns (lhs, col_offsets, ranks, sizes)."""
    nmode = len(factors)
    sizes = tuple(int(f.shape[1]) for f in factors)
    ranks = tuple(int(f.shape[0]) for f in factors) + (int(factors[-1].shape[2]),)
    m_total = _GP * sum(ranks[:nmode])
    i_total = sum(sizes)

    lhs = jnp.zeros((m_total, i_total), jnp.float32)
    col_offsets = []
    m_cur, c_cur = 0, 0
    for k in range(nmode):
        r_prev, r_next = ranks[k], ranks[k + 1]
        fk = jnp.asarray(factors[k], jnp.float32)                # (r_prev, I_k, r_next)
        for i in range(r_prev):
            lhs = lhs.at[m_cur + i * _GP: m_cur + i * _GP + r_next,
                         c_cur: c_cur + sizes[k]].set(fk[i].T)   # (r_next, I_k)
        col_offsets.append(c_cur)
        m_cur += _GP * r_prev
        c_cur += sizes[k]
    return (lhs, jnp.asarray(col_offsets, jnp.int32), ranks, sizes)


# ---------------------------------------------------------------------------
# Forward pass.
# ---------------------------------------------------------------------------
@functools.partial(jax.jit, static_argnames=("ranks", "sizes", "b_tile"))
def _tt_forward_jit(lhs, col_off, idxs, *, ranks, sizes, b_tile):
    nmode = len(sizes)
    i_total = sum(sizes)
    m_total = _GP * sum(ranks[:nmode])
    B = idxs.shape[0]
    n_tiles = pl.cdiv(B, b_tile)
    b_pad = n_tiles * b_tile

    # (nmode, B_pad) int32 with per-mode column offsets pre-added.  Padded batch
    # columns point at column 0 of their mode (valid) and are sliced off below.
    idx_off = idxs.astype(jnp.int32).T + col_off[:, None]
    idx_t = jnp.broadcast_to(col_off[:, None], (nmode, b_pad))
    idx_t = idx_t.at[:, :B].set(idx_off)

    flops = 2 * b_pad * m_total * i_total                 # fused one-hot gather matmul
    for k in range(1, nmode):
        flops += 2 * b_pad * ranks[k] * _GP               # rank-contraction FMAs
    bytes_accessed = idx_t.size * 4 + lhs.size * 4 + b_pad * 4

    kernel = _make_tt_entry_kernel(ranks, sizes, b_tile)

    out = pl.pallas_call(
        kernel,
        out_shape=jax.ShapeDtypeStruct((n_tiles, 1, b_tile), jnp.float32),
        grid_spec=pltpu.PrefetchScalarGridSpec(
            num_scalar_prefetch=0,
            grid=(n_tiles,),
            in_specs=[pl.BlockSpec((nmode, b_tile), lambda i: (0, i)),
                      pl.BlockSpec(lhs.shape, lambda i: (0, 0))],
            out_specs=pl.BlockSpec((1, 1, b_tile), lambda i: (i, 0, 0)),
        ),
        compiler_params=pltpu.CompilerParams(
            dimension_semantics=("parallel",)),            # batch tiles over TCs (v7x)
        cost_estimate=pl.CostEstimate(flops=int(flops), transcendentals=0,
                                      bytes_accessed=int(bytes_accessed)),
    )(idx_t, lhs)

    return out.reshape(-1)[:B]


def tt_forward(prepared, idxs):
    """Equivalent of tensor_train_completion.forward(idxs) -> (B,) float32."""
    lhs, col_off, ranks, sizes = prepared
    b_tile = _choose_b_tile(int(idxs.shape[0]), sum(sizes))
    return _tt_forward_jit(lhs, col_off, idxs,
                           ranks=ranks, sizes=sizes, b_tile=b_tile)


# ---------------------------------------------------------------------------
# Deterministic TT-factor initialization (mirrors nn.ParameterList of
# torch.rand(factor.shape) over tensorly TT-shaped factors).
# ---------------------------------------------------------------------------
def make_tt_factors(key, tensor_size, rank):
    nmode = len(tensor_size)
    ranks = [1] + [rank] * (nmode - 1) + [1]
    for k in range(1, nmode):                       # tensorly-style rank clipping
        left = math.prod(tensor_size[:k])
        right = math.prod(tensor_size[k:])
        ranks[k] = min(ranks[k], left, right)
    keys = jax.random.split(key, nmode)
    return [
        jax.random.uniform(keys[k], (ranks[k], tensor_size[k], ranks[k + 1]),
                           dtype=jnp.float32)
        for k in range(nmode)
    ]


# ---------------------------------------------------------------------------
# Pure-JAX reference: full tt_to_tensor reconstruction + gather (the literal
# PyTorch forward), used only for validation.
# ---------------------------------------------------------------------------
def ref_forward(factors, idxs):
    full_shape = tuple(int(f.shape[1]) for f in factors)
    full = factors[0].reshape(full_shape[0], -1)
    for f in factors[1:]:
        rp, n, rn = f.shape
        full = full @ f.reshape(rp, n * rn)
        full = full.reshape(-1, rn)
    full = full.reshape(full_shape)
    return full[tuple(idxs[:, k] for k in range(len(full_shape)))]


if __name__ == "__main__":
    rank = 4
    tensor_size = (16, 16, 16)   # 3-mode tensor, TT ranks (1, 4, 4, 1)

    key = jax.random.PRNGKey(0)
    k_fac, k_idx = jax.random.split(key)

    factors = make_tt_factors(k_fac, tensor_size, rank)
    prepared = prepare_tt_factors(factors)   # one-time packing (block-diagonal LHS)

    def make_idxs(k, batch):
        return jnp.stack(
            [jax.random.randint(jax.random.fold_in(k, m), (batch,), 0,
                                tensor_size[m], dtype=jnp.int32)
             for m in range(len(tensor_size))],
            axis=1)   # (B, nmode)

    # Small batch (single 128 tile) — matches the module's typical usage.
    idxs_small = make_idxs(k_idx, 8)
    out_small = jax.block_until_ready(tt_forward(prepared, idxs_small))
    ref_small = ref_forward(factors, idxs_small)
    assert out_small.shape == (8,) and out_small.dtype == jnp.float32
    assert jnp.allclose(out_small, ref_small, rtol=1e-5, atol=1e-5), (out_small, ref_small)

    # Larger ragged batch — exercises multi-tile grid + padded batch columns.
    idxs_big = make_idxs(jax.random.fold_in(k_idx, 99), 300)
    out_big = jax.block_until_ready(tt_forward(prepared, idxs_big))
    ref_big = ref_forward(factors, idxs_big)
    assert out_big.shape == (300,)
    assert jnp.allclose(out_big, ref_big, rtol=1e-5, atol=1e-5)

    print("KERNEL_OK")
</pallas_src>

<mosaic_0001>
module attributes {stable_mosaic.version = 11 : i64} {
  func.func @kernel(%arg0: i32, %arg1: memref<3x128xi32, #tpu.memory_space<vmem>>, %arg2: memref<72x48xf32, #tpu.memory_space<vmem>>, %arg3: memref<1x1x128xf32, #tpu.memory_space<vmem>>) attributes {dimension_semantics = [#tpu.dimension_semantics<parallel>], iteration_bounds = array<i64: 1>, scalar_prefetch = 0 : i64, scratch_operands = 0 : i64, tpu.core_type = #tpu.core_type<tc>, window_params = [{transform_indices = @transform_0, window_bounds = array<i64: 3, 128>}, {pipeline_mode = #tpu.pipeline_mode<synchronous>, transform_indices = @transform_1, window_bounds = array<i64: 72, 48>}, {transform_indices = @transform_2, window_bounds = array<i64: 1, 1, 128>}]} {
    %0 = tpu.iota {dimensions = array<i32: 0>} : vector<48x128xi32>
    %c0 = arith.constant 0 : index
    %c0_0 = arith.constant 0 : index
    %1 = vector.load %arg1[%c0, %c0_0] : memref<3x128xi32, #tpu.memory_space<vmem>>, vector<1x128xi32>
    %2 = vector.broadcast %1 : vector<1x128xi32> to vector<48x128xi32>
    %3 = arith.cmpi eq, %0, %2 : vector<48x128xi32>
    %c1 = arith.constant 1 : index
    %c0_1 = arith.constant 0 : index
    %4 = vector.load %arg1[%c1, %c0_1] : memref<3x128xi32, #tpu.memory_space<vmem>>, vector<1x128xi32>
    %5 = vector.broadcast %4 : vector<1x128xi32> to vector<48x128xi32>
    %6 = arith.cmpi eq, %0, %5 : vector<48x128xi32>
    %7 = arith.ori %3, %6 : vector<48x128xi1>
    %c2 = arith.constant 2 : index
    %c0_2 = arith.constant 0 : index
    %8 = vector.load %arg1[%c2, %c0_2] : memref<3x128xi32, #tpu.memory_space<vmem>>, vector<1x128xi32>
    %9 = vector.broadcast %8 : vector<1x128xi32> to vector<48x128xi32>
    %10 = arith.cmpi eq, %0, %9 : vector<48x128xi32>
    %11 = arith.ori %7, %10 : vector<48x128xi1>
    %12 = arith.extui %11 : vector<48x128xi1> to vector<48x128xi32>
    %13 = arith.sitofp %12 : vector<48x128xi32> to vector<48x128xf32>
    %c0_3 = arith.constant 0 : index
    %c0_4 = arith.constant 0 : index
    %14 = vector.load %arg2[%c0_3, %c0_4] : memref<72x48xf32, #tpu.memory_space<vmem>>, vector<72x48xf32>
    %cst = arith.constant dense<0.000000e+00> : vector<72x128xf32>
    %15 = tpu.matmul %14, %13, %cst {dimension_numbers = #tpu.dot_dimension_numbers<[1], [0], [0], [1], [0, 0, 1, 1], [], []>} : vector<72x48xf32>, vector<48x128xf32>, vector<72x128xf32> -> vector<72x128xf32>
    %16 = vector.extract_strided_slice %15 {offsets = [0, 0], sizes = [8, 128], strides = [1, 1]} : vector<72x128xf32> to vector<8x128xf32>
    %17 = vector.extract_strided_slice %16 {offsets = [0, 0], sizes = [1, 128], strides = [1, 1]} : vector<8x128xf32> to vector<1x128xf32>
    %18 = vector.extract_strided_slice %15 {offsets = [8, 0], sizes = [8, 128], strides = [1, 1]} : vector<72x128xf32> to vector<8x128xf32>
    %19 = vector.broadcast %17 : vector<1x128xf32> to vector<8x128xf32>
    %20 = arith.mulf %19, %18 : vector<8x128xf32>
    %21 = vector.extract_strided_slice %16 {offsets = [1, 0], sizes = [1, 128], strides = [1, 1]} : vector<8x128xf32> to vector<1x128xf32>
    %22 = vector.extract_strided_slice %15 {offsets = [16, 0], sizes = [8, 128], strides = [1, 1]} : vector<72x128xf32> to vector<8x128xf32>
    %23 = vector.broadcast %21 : vector<1x128xf32> to vector<8x128xf32>
    %24 = arith.mulf %23, %22 : vector<8x128xf32>
    %25 = vector.extract_strided_slice %16 {offsets = [2, 0], sizes = [1, 128], strides = [1, 1]} : vector<8x128xf32> to vector<1x128xf32>
    %26 = vector.extract_strided_slice %15 {offsets = [24, 0], sizes = [8, 128], strides = [1, 1]} : vector<72x128xf32> to vector<8x128xf32>
    %27 = vector.broadcast %25 : vector<1x128xf32> to vector<8x128xf32>
    %28 = arith.mulf %27, %26 : vector<8x128xf32>
    %29 = vector.extract_strided_slice %16 {offsets = [3, 0], sizes = [1, 128], strides = [1, 1]} : vector<8x128xf32> to vector<1x128xf32>
    %30 = vector.extract_strided_slice %15 {offsets = [32, 0], sizes = [8, 128], strides = [1, 1]} : vector<72x128xf32> to vector<8x128xf32>
    %31 = vector.broadcast %29 : vector<1x128xf32> to vector<8x128xf32>
    %32 = arith.mulf %31, %30 : vector<8x128xf32>
    %33 = arith.addf %20, %24 : vector<8x128xf32>
    %34 = arith.addf %28, %32 : vector<8x128xf32>
    %35 = arith.addf %33, %34 : vector<8x128xf32>
    %36 = vector.extract_strided_slice %35 {offsets = [0, 0], sizes = [1, 128], strides = [1, 1]} : vector<8x128xf32> to vector<1x128xf32>
    %37 = vector.extract_strided_slice %15 {offsets = [40, 0], sizes = [8, 128], strides = [1, 1]} : vector<72x128xf32> to vector<8x128xf32>
    %38 = vector.broadcast %36 : vector<1x128xf32> to vector<8x128xf32>
    %39 = arith.mulf %38, %37 : vector<8x128xf32>
    %40 = vector.extract_strided_slice %35 {offsets = [1, 0], sizes = [1, 128], strides = [1, 1]} : vector<8x128xf32> to vector<1x128xf32>
    %41 = vector.extract_strided_slice %15 {offsets = [48, 0], sizes = [8, 128], strides = [1, 1]} : vector<72x128xf32> to vector<8x128xf32>
    %42 = vector.broadcast %40 : vector<1x128xf32> to vector<8x128xf32>
    %43 = arith.mulf %42, %41 : vector<8x128xf32>
    %44 = vector.extract_strided_slice %35 {offsets = [2, 0], sizes = [1, 128], strides = [1, 1]} : vector<8x128xf32> to vector<1x128xf32>
    %45 = vector.extract_strided_slice %15 {offsets = [56, 0], sizes = [8, 128], strides = [1, 1]} : vector<72x128xf32> to vector<8x128xf32>
    %46 = vector.broadcast %44 : vector<1x128xf32> to vector<8x128xf32>
    %47 = arith.mulf %46, %45 : vector<8x128xf32>
    %48 = vector.extract_strided_slice %35 {offsets = [3, 0], sizes = [1, 128], strides = [1, 1]} : vector<8x128xf32> to vector<1x128xf32>
    %49 = vector.extract_strided_slice %15 {offsets = [64, 0], sizes = [8, 128], strides = [1, 1]} : vector<72x128xf32> to vector<8x128xf32>
    %50 = vector.broadcast %48 : vector<1x128xf32> to vector<8x128xf32>
    %51 = arith.mulf %50, %49 : vector<8x128xf32>
    %52 = arith.addf %39, %43 : vector<8x128xf32>
    %53 = arith.addf %47, %51 : vector<8x128xf32>
    %54 = arith.addf %52, %53 : vector<8x128xf32>
    %55 = vector.extract_strided_slice %54 {offsets = [0, 0], sizes = [1, 128], strides = [1, 1]} : vector<8x128xf32> to vector<1x128xf32>
    %56 = vector.shape_cast %55 : vector<1x128xf32> to vector<1x1x128xf32>
    %c0_5 = arith.constant 0 : index
    %c0_6 = arith.constant 0 : index
    %c0_7 = arith.constant 0 : index
    %57 = vector.load %arg3[%c0_5, %c0_6, %c0_7] : memref<1x1x128xf32, #tpu.memory_space<vmem>>, vector<1x1x128xf32>
    tpu.vector_store %arg3[%c0_5, %c0_6, %c0_7], %56 {strides = array<i32>} : memref<1x1x128xf32, #tpu.memory_space<vmem>>, vector<1x1x128xf32>,
    return
  }
  func.func @transform_0(%arg0: i32) -> (i32, i32) {
    %c0_i32 = arith.constant 0 : i32
    %c0_i32_0 = arith.constant 0 : i32
    return %c0_i32, %arg0 : i32, i32
  }
  func.func @transform_1(%arg0: i32) -> (i32, i32) {
    %c0_i32 = arith.constant 0 : i32
    %c0_i32_0 = arith.constant 0 : i32
    %c0_i32_1 = arith.constant 0 : i32
    return %c0_i32, %c0_i32_0 : i32, i32
  }
  func.func @transform_2(%arg0: i32) -> (i32, i32, i32) {
    %c0_i32 = arith.constant 0 : i32
    %c0_i32_0 = arith.constant 0 : i32
    %c0_i32_1 = arith.constant 0 : i32
    return %arg0, %c0_i32, %c0_i32_0 : i32, i32, i32
  }
}

</mosaic_0001>

<bundles_post_ra>
// kernel: _tt_forward_jit.1
= control target key start
LH: loop header
LB: loop body
LE: loop exit
PB: predicated region body
PF: predicated region fallthrough
CT: control target
= control target key end

     0   :  { %v11_v0 = vlaneseq  ;;  %v291_v9 = vmov 0  ;;  %v217_v11 = vmov 1.0   ;;  %s288_s0 = inlined_call_operand.vmem [shape: s32[3,128], index: 0, kind: input, shape index: {}]   ;;  %s289_s1 = inlined_call_operand.vmem [shape: f32[72,48], index: 1, kind: input, shape index: {}]   ;;  %s290_s2 = inlined_call_operand.vmem [shape: f32[1,1,128], index: 2, kind: output, shape index: {}]  }
   0x1   :  { %v214_v1 = vld [vmem:[%s288_s0] ss:$0 sm:$0xff]  ;;  %v215_v3 = vld [vmem:[%s288_s0 + $0x1] ss:$0 sm:$0xff]  ;;  %v216_v4 = vld [vmem:[%s288_s0 + $0x2] ss:$0 sm:$0xff] }
   0x2   :  { %v12_v2 = vshrl.u32 %v11_v0, 7  ;;  %v66_v12 = vld [vmem:[%s289_s1] sm:$0xff]  ;;  %v68_v13 = vld [vmem:[%s289_s1 + $0x10] sm:$0xff]  ;;  %v73_v15 = vld [vmem:[%s289_s1 + $0x38] sm:$0xff] }
   0x3   :  { %v70_v14 = vld [vmem:[%s289_s1 + $0x20] sm:$0xff]  ;;  %v67_v16 = vld [vmem:[%s289_s1 + $0x8] sm:$0xff]  ;;  %v69_v17 = vld [vmem:[%s289_s1 + $0x18] sm:$0xff] }
   0x4   :  { %v17_v5 = vadd.s32 40, %v12_v2  ;;  %v16_v6 = vadd.s32 32, %v12_v2  ;;  %v15_v7 = vadd.s32 24, %v12_v2  ;;  %v14_v8 = vadd.s32 16, %v12_v2  ;;  %v71_v18 = vld [vmem:[%s289_s1 + $0x28] sm:$0xff]  ;;  %v74_v19 = vld [vmem:[%s289_s1 + $0x40] sm:$0xff] }
   0x5   :  { %vm20_vm0 = vcmp.eq.s32.totalorder %v12_v2, %v214_v1  ;;  %vm28_vm1 = vcmp.eq.s32.totalorder %v12_v2, %v215_v3  ;;  %v13_v10 = vadd.s32 8, %v12_v2  ;;  %v72_v20 = vld [vmem:[%s289_s1 + $0x30] sm:$0xff] }
   0x6   :  { %vm25_vm2 = vcmp.eq.s32.totalorder %v17_v5, %v214_v1  ;;  %vm33_vm3 = vcmp.eq.s32.totalorder %v17_v5, %v215_v3  ;;  %vm47_vm4 = vcmp.eq.s32.totalorder %v17_v5, %v216_v4  ;;  %vm24_vm5 = vcmp.eq.s32.totalorder %v16_v6, %v214_v1  ;;  %vm242_vm6 = vmor %vm20_vm0, %vm28_vm1 }
   0x7   :  { %v292_v9 = vsel %vm242_vm6, 4294967295, %v291_v9  ;;  %vm39_vm7 = vmor %vm25_vm2, %vm33_vm3  ;;  %vm32_vm8 = vcmp.eq.s32.totalorder %v16_v6, %v215_v3  ;;  %vm46_vm9 = vcmp.eq.s32.totalorder %v16_v6, %v216_v4  ;;  %vm23_vm11 = vcmp.eq.s32.totalorder %v15_v7, %v214_v1 }
   0x8   :  { %vm53_vm10 = vmor %vm39_vm7, %vm47_vm4  ;;  %vm31_vm12 = vcmp.eq.s32.totalorder %v15_v7, %v215_v3  ;;  %vm45_vm14 = vcmp.eq.s32.totalorder %v15_v7, %v216_v4  ;;  %vm22_vm0 = vcmp.eq.s32.totalorder %v14_v8, %v214_v1  ;;  %vm30_vm1 = vcmp.eq.s32.totalorder %v14_v8, %v215_v3 }
   0x9   :  { %180 = vmatpush.msk.msra.mxu0 %vm53_vm10, %v217_v11  ;;  %195 = vmatpush.msk.msra.mxu1 %vm53_vm10, %v217_v11  ;;  %vm38_vm13 = vmor %vm24_vm5, %vm32_vm8  ;;  %vm44_vm3 = vcmp.eq.s32.totalorder %v14_v8, %v216_v4  ;;  %vm21_vm7 = vcmp.eq.s32.totalorder %v13_v10, %v214_v1  ;;  %vm29_vm6 = vcmp.eq.s32.totalorder %v13_v10, %v215_v3 }
   0xa   :  { %196 = vmatpush.msk.msra.mxu2 %vm53_vm10, %v217_v11  ;;  %197 = vmatpush.msk.msra.mxu3 %vm53_vm10, %v217_v11  ;;  %vm52_vm15 = vmor %vm38_vm13, %vm46_vm9  ;;  %vm43_vm8 = vcmp.eq.s32.totalorder %v13_v10, %v216_v4  ;;  %vm42_vm9 = vcmp.eq.s32.totalorder %v12_v2, %v216_v4 }
   0xb   :  { %181 = vmatpush.msk.msra.mxu0 %vm52_vm15, %v217_v11  ;;  %198 = vmatpush.msk.msra.mxu1 %vm52_vm15, %v217_v11  ;;  %vm37_vm2 = vmor %vm23_vm11, %vm31_vm12  ;;  %vm293_vm12 = vnez %v292_v9 }
   0xc   :  { %199 = vmatpush.msk.msra.mxu2 %vm52_vm15, %v217_v11  ;;  %200 = vmatpush.msk.msra.mxu3 %vm52_vm15, %v217_v11  ;;  %vm51_vm4 = vmor %vm37_vm2, %vm45_vm14  ;;  %vm75_vm15 = vcmask 392192  }
   0xd   :  { %182 = vmatpush.msk.msra.mxu0 %vm51_vm4, %v217_v11  ;;  %201 = vmatpush.msk.msra.mxu1 %vm51_vm4, %v217_v11  ;;  %vm36_vm5 = vmor %vm22_vm0, %vm30_vm1 }
   0xe   :  { %202 = vmatpush.msk.msra.mxu2 %vm51_vm4, %v217_v11  ;;  %203 = vmatpush.msk.msra.mxu3 %vm51_vm4, %v217_v11  ;;  %vm50_vm10 = vmor %vm36_vm5, %vm44_vm3 }
   0xf   :  { %183 = vmatpush.msk.msra.mxu0 %vm50_vm10, %v217_v11  ;;  %204 = vmatpush.msk.msra.mxu1 %vm50_vm10, %v217_v11  ;;  %vm35_vm13 = vmor %vm21_vm7, %vm29_vm6 }
  0x10   :  { %205 = vmatpush.msk.msra.mxu2 %vm50_vm10, %v217_v11  ;;  %206 = vmatpush.msk.msra.mxu3 %vm50_vm10, %v217_v11  ;;  %vm49_vm11 = vmor %vm35_vm13, %vm43_vm8 }
  0x11   :  { %184 = vmatpush.msk.msra.mxu0 %vm49_vm11, %v217_v11  ;;  %207 = vmatpush.msk.msra.mxu1 %vm49_vm11, %v217_v11  ;;  %vm48_vm14 = vmor %vm293_vm12, %vm42_vm9 }
  0x12   :  { %208 = vmatpush.msk.msra.mxu2 %vm49_vm11, %v217_v11  ;;  %209 = vmatpush.msk.msra.mxu3 %vm49_vm11, %v217_v11 }
  0x13   :  { %185 = vmatpush.msk.msra.mxu0 %vm48_vm14, %v217_v11  ;;  %210 = vmatpush.msk.msra.mxu1 %vm48_vm14, %v217_v11 }
  0x14   :  { %211 = vmatpush.msk.msra.mxu2 %vm48_vm14, %v217_v11  ;;  %186 = vmatmul.msk.f32.vlgmr.msra.gmra.mxu0 %vm75_vm15, %v66_v12 }
  0x15   :  { %188 = vmatmul.msk.f32.vlgmr.msra.gmra.mxu1 %vm75_vm15, %v68_v13  ;;  %190 = vmatmul.msk.f32.vlgmr.msra.gmra.mxu2 %vm75_vm15, %v70_v14 }
  0x16   :  { %212 = vmatpush.msk.msra.mxu3 %vm48_vm14, %v217_v11 }
  0x17   :  { %193 = vmatmul.msk.f32.vlgmr.msra.gmra.mxu3 %vm75_vm15, %v73_v15 }
  0x1c   :  { %187 = vmatmul.msk.f32.gmra.mxu0 %vm75_vm15, %v67_v16 }
  0x1d   :  { %189 = vmatmul.msk.f32.gmra.mxu1 %vm75_vm15, %v69_v17  ;;  %191 = vmatmul.msk.f32.gmra.mxu2 %vm75_vm15, %v71_v18 }
  0x1f   :  { %194 = vmatmul.msk.f32.gmra.mxu3 %vm75_vm15, %v74_v19 }
  0x25   :  { %192 = vmatmul.msk.f32.gmra.mxu2 %vm75_vm15, %v72_v20 }
  0x91   :  { %v120_v21 = vpop.f32.mrf.mxu0 }
  0x92   :  { %v126_v22 = vpop.f32.mrf.mxu1  ;;  %v149_v23 = vperm.slane %v120_v21, 1  ;;  %v147_v24 = vperm.slane %v120_v21, 0  ;;  %v153_v25 = vperm.slane %v120_v21, 3  ;;  %v151_v26 = vperm.slane %v120_v21, 2 }
  0x94   :  { %v150_v29 = vmul.f32 %v149_v23, %v126_v22 }
  0x98   :  { %v132_v27 = vpop.f32.mrf.mxu2 }
  0x99   :  { %v123_v28 = vpop.f32.mrf.mxu0  ;;  %v154_v33 = vmul.f32 %v153_v25, %v132_v27 }
  0x9a   :  { %v148_v30 = vmul.f32 %v147_v24, %v123_v28  ;;  %v129_v31 = vpop.f32.mrf.mxu1  ;;  %v141_v32 = vpop.f32.mrf.mxu3 }
  0x9b   :  { %v152_v34 = vmul.f32 %v151_v26, %v129_v31 }
  0x9c   :  { %v155_v35 = vadd.f32 %v150_v29, %v148_v30 }
  0x9d   :  { %v156_v36 = vadd.f32 %v154_v33, %v152_v34 }
  0x9f   :  { %v157_v37 = vadd.f32 %v156_v36, %v155_v35 }
  0xa0   :  { %v135_v38 = vpop.f32.mrf.mxu2 }
  0xa1   :  { %v162_v39 = vperm.slane %v157_v37, 2  ;;  %v164_v40 = vperm.slane %v157_v37, 3  ;;  %v158_v42 = vperm.slane %v157_v37, 0  ;;  %v160_v45 = vperm.slane %v157_v37, 1 }
  0xa2   :  { %v144_v41 = vpop.f32.mrf.mxu3 }
  0xa3   :  { %v163_v43 = vmul.f32 %v162_v39, %v141_v32  ;;  %v165_v44 = vmul.f32 %v164_v40, %v144_v41  ;;  %v159_v47 = vmul.f32 %v158_v42, %v135_v38 }
  0xa5   :  { %v167_v49 = vadd.f32 %v165_v44, %v163_v43 }
  0xa8   :  { %v138_v46 = vpop.f32.mrf.mxu2 }
  0xa9   :  { %v161_v48 = vmul.f32 %v160_v45, %v138_v46 }
  0xab   :  { %v166_v50 = vadd.f32 %v161_v48, %v159_v47 }
  0xad   :  { %v168_v51 = vadd.f32 %v167_v49, %v166_v50 }
  0xaf   :  { %169 = vst [vmem:[%s290_s2] sm:$0x1] %v168_v51 }

</bundles_post_ra>
